<compile_context>
chip_gen: v7x
topology: tpu7x:2x2x1
jax: 0.10.0
libtpu: 0.0.40
codegen_flags: <defaults>
</compile_context>

<pallas_src>
import functools
import math

import jax
import jax.numpy as jnp
from jax import lax
from jax.experimental import pallas as pl
from jax.experimental.pallas import tpu as pltpu


def _critic_kernel(s_ref, a_ref, w1s_ref, w1a_ref, b1_ref,
                   w2_ref, b2_ref, w3_ref, b3_ref, o_ref):
    """Fused 3-layer MLP for one batch tile (everything resident in VMEM)."""
    # Layer 1: concat([s, a]) @ W1 == s @ W1s + a @ W1a  (split K, no concat).
    h1 = jnp.dot(s_ref[...], w1s_ref[...], preferred_element_type=jnp.float32)
    h1 = h1 + jnp.dot(a_ref[...], w1a_ref[...],
                      preferred_element_type=jnp.float32)
    h1 = jnp.maximum(h1 + b1_ref[...], 0.0)

    # Layer 2.
    h2 = jnp.dot(h1, w2_ref[...], preferred_element_type=jnp.float32) + b2_ref[...]
    h2 = jnp.maximum(h2, 0.0)

    # Output layer: contract H2 of (1, H2) with H2 of (tile, H2) -> (1, tile).
    # Result is lane-dense (batch on the lane axis), so the store is a
    # full-width vst rather than a 1-lane masked store.
    q = lax.dot_general(
        w3_ref[...], h2,
        dimension_numbers=(((1,), (1,)), ((), ())),
        preferred_element_type=jnp.float32)
    q = q + b3_ref[0]                          # scalar bias from SMEM
    o_ref[...] = q[None].astype(o_ref.dtype)   # (1, 1, tile)


def _round_up(x, m):
    return ((x + m - 1) // m) * m


@functools.partial(jax.jit, static_argnames=("batch_tile",))
def critic_forward(state, action, params, *, batch_tile=512):
    """Q(s, a) via a batch-tiled, fully fused Pallas kernel.

    state:  (B, state_dim)  float32
    action: (B, action_dim) float32
    params: w1 (D,H1), b1 (1,H1), w2 (H1,H2), b2 (1,H2), w3 (H2,1), b3 (1,1)
            (weights stored transposed relative to PyTorch: (in, out))
    returns (B, 1) float32
    """
    state = state.astype(jnp.float32)
    action = action.astype(jnp.float32)
    b, sd = state.shape
    ad = action.shape[1]
    w1, b1 = params["w1"], params["b1"]
    w2, b2 = params["w2"], params["b2"]
    w3, b3 = params["w3"], params["b3"]
    h1d = w1.shape[1]
    h2d = w2.shape[1]

    # Split W1 so the kernel never needs concat([state, action]).
    w1s, w1a = w1[:sd], w1[sd:]
    w3_row = w3.reshape(1, h2d)      # (H2, 1) column -> (1, H2) row (same order)
    b3_s = b3.reshape((1,))          # scalar bias, lives in SMEM

    # Adaptive batch tile: a few large parallel grid steps, rows padded to a
    # multiple of 8 sublanes (multiples of 128 for the common pow-2 batches).
    n_steps = max(1, -(-b // batch_tile))
    tile = _round_up(-(-b // n_steps), 8)
    bp = n_steps * tile
    if bp != b:
        state = jnp.pad(state, ((0, bp - b), (0, 0)))
        action = jnp.pad(action, ((0, bp - b), (0, 0)))

    out = pl.pallas_call(
        _critic_kernel,
        out_shape=jax.ShapeDtypeStruct((n_steps, 1, tile), jnp.float32),
        grid_spec=pltpu.PrefetchScalarGridSpec(
            num_scalar_prefetch=0,
            grid=(n_steps,),
            in_specs=[
                pl.BlockSpec((tile, sd), lambda i: (i, 0)),     # state tile
                pl.BlockSpec((tile, ad), lambda i: (i, 0)),     # action tile
                pl.BlockSpec((sd, h1d), lambda i: (0, 0)),      # W1[:state_dim]
                pl.BlockSpec((ad, h1d), lambda i: (0, 0)),      # W1[state_dim:]
                pl.BlockSpec((1, h1d), lambda i: (0, 0)),       # b1
                pl.BlockSpec((h1d, h2d), lambda i: (0, 0)),     # W2
                pl.BlockSpec((1, h2d), lambda i: (0, 0)),       # b2
                pl.BlockSpec((1, h2d), lambda i: (0, 0)),       # W3 as row
                pl.BlockSpec(memory_space=pltpu.MemorySpace.SMEM),  # b3 scalar
            ],
            out_specs=pl.BlockSpec((1, 1, tile), lambda i: (i, 0, 0)),
        ),
        compiler_params=pltpu.CompilerParams(
            dimension_semantics=("parallel",)),
    )(state, action, w1s, w1a, b1, w2, b2, w3_row, b3_s)

    # (n_steps, 1, tile) -> (bp, 1); each tile's q values are contiguous rows.
    return out.reshape(bp, 1)[:b]


def _xavier_uniform(key, fan_in, fan_out):
    """Matches torch.nn.init.xavier_uniform_ (gain=1), stored as (in, out)."""
    bound = math.sqrt(6.0 / (fan_in + fan_out))
    return jax.random.uniform(
        key, (fan_in, fan_out), minval=-bound, maxval=bound, dtype=jnp.float32
    )


def init_critic_params(key, state_dim, action_dim, hidden_sizes):
    input_dim = state_dim + action_dim
    k1, k2, k3 = jax.random.split(key, 3)
    return {
        "w1": _xavier_uniform(k1, input_dim, hidden_sizes[0]),
        "b1": jnp.zeros((1, hidden_sizes[0]), jnp.float32),
        "w2": _xavier_uniform(k2, hidden_sizes[0], hidden_sizes[1]),
        "b2": jnp.zeros((1, hidden_sizes[1]), jnp.float32),
        "w3": _xavier_uniform(k3, hidden_sizes[1], 1),
        "b3": jnp.zeros((1, 1), jnp.float32),
    }


def _reference_forward(state, action, params):
    x = jnp.concatenate([state, action], axis=1)
    h1 = jax.nn.relu(x @ params["w1"] + params["b1"])
    h2 = jax.nn.relu(h1 @ params["w2"] + params["b2"])
    return h2 @ params["w3"] + params["b3"]


if __name__ == "__main__":
    state_dim, action_dim = 8, 4
    hidden_sizes = (32, 32)

    key = jax.random.PRNGKey(0)
    kp, ks, ka = jax.random.split(key, 3)
    params = init_critic_params(kp, state_dim, action_dim, hidden_sizes)

    # Small-batch check (single padded tile, grid of 1).
    batch = 2
    state = jax.random.normal(ks, (batch, state_dim), dtype=jnp.float32)
    action = jax.random.normal(ka, (batch, action_dim), dtype=jnp.float32)
    q = jax.block_until_ready(critic_forward(state, action, params))
    q_ref = _reference_forward(state, action, params)
    assert q.shape == (batch, 1)
    assert jnp.allclose(q, q_ref, atol=1e-5, rtol=1e-5)

    # Multi-tile check (grid of 2 parallel steps, lane-dense 128-wide output).
    batch2 = 256
    ks2, ka2 = jax.random.split(jax.random.PRNGKey(1))
    state2 = jax.random.normal(ks2, (batch2, state_dim), dtype=jnp.float32)
    action2 = jax.random.normal(ka2, (batch2, action_dim), dtype=jnp.float32)
    q2 = jax.block_until_ready(
        critic_forward(state2, action2, params, batch_tile=128))
    q2_ref = _reference_forward(state2, action2, params)
    assert q2.shape == (batch2, 1)
    assert jnp.allclose(q2, q2_ref, atol=1e-4, rtol=1e-4)

    print("KERNEL_OK")
</pallas_src>

<mosaic_0001>
module attributes {stable_mosaic.version = 11 : i64} {
  func.func @_critic_kernel(%arg0: i32, %arg1: memref<8x8xf32, #tpu.memory_space<vmem>>, %arg2: memref<8x4xf32, #tpu.memory_space<vmem>>, %arg3: memref<8x32xf32, #tpu.memory_space<vmem>>, %arg4: memref<4x32xf32, #tpu.memory_space<vmem>>, %arg5: memref<1x32xf32, #tpu.memory_space<vmem>>, %arg6: memref<32x32xf32, #tpu.memory_space<vmem>>, %arg7: memref<1x32xf32, #tpu.memory_space<vmem>>, %arg8: memref<1x32xf32, #tpu.memory_space<vmem>>, %arg9: memref<1xf32, #tpu.memory_space<smem>>, %arg10: memref<1x1x8xf32, #tpu.memory_space<vmem>>) attributes {dimension_semantics = [#tpu.dimension_semantics<parallel>], iteration_bounds = array<i64: 1>, scalar_prefetch = 0 : i64, scratch_operands = 0 : i64, tpu.core_type = #tpu.core_type<tc>, window_params = [{transform_indices = @transform_0, window_bounds = array<i64: 8, 8>}, {transform_indices = @transform_1, window_bounds = array<i64: 8, 4>}, {pipeline_mode = #tpu.pipeline_mode<synchronous>, transform_indices = @transform_2, window_bounds = array<i64: 8, 32>}, {pipeline_mode = #tpu.pipeline_mode<synchronous>, transform_indices = @transform_3, window_bounds = array<i64: 4, 32>}, {pipeline_mode = #tpu.pipeline_mode<synchronous>, transform_indices = @transform_4, window_bounds = array<i64: 1, 32>}, {pipeline_mode = #tpu.pipeline_mode<synchronous>, transform_indices = @transform_5, window_bounds = array<i64: 32, 32>}, {pipeline_mode = #tpu.pipeline_mode<synchronous>, transform_indices = @transform_6, window_bounds = array<i64: 1, 32>}, {pipeline_mode = #tpu.pipeline_mode<synchronous>, transform_indices = @transform_7, window_bounds = array<i64: 1, 32>}, {transform_indices = @transform_8, window_bounds = array<i64: 1>}, {transform_indices = @transform_9, window_bounds = array<i64: 1, 1, 8>}]} {
    %c0 = arith.constant 0 : index
    %c0_0 = arith.constant 0 : index
    %0 = vector.load %arg1[%c0, %c0_0] : memref<8x8xf32, #tpu.memory_space<vmem>>, vector<8x8xf32>
    %c0_1 = arith.constant 0 : index
    %c0_2 = arith.constant 0 : index
    %1 = vector.load %arg3[%c0_1, %c0_2] : memref<8x32xf32, #tpu.memory_space<vmem>>, vector<8x32xf32>
    %cst = arith.constant dense<0.000000e+00> : vector<8x32xf32>
    %2 = tpu.matmul %0, %1, %cst {dimension_numbers = #tpu.dot_dimension_numbers<[1], [0], [0], [1], [0, 0, 1, 1], [], []>} : vector<8x8xf32>, vector<8x32xf32>, vector<8x32xf32> -> vector<8x32xf32>
    %c0_3 = arith.constant 0 : index
    %c0_4 = arith.constant 0 : index
    %3 = vector.load %arg2[%c0_3, %c0_4] : memref<8x4xf32, #tpu.memory_space<vmem>>, vector<8x4xf32>
    %c0_5 = arith.constant 0 : index
    %c0_6 = arith.constant 0 : index
    %4 = vector.load %arg4[%c0_5, %c0_6] : memref<4x32xf32, #tpu.memory_space<vmem>>, vector<4x32xf32>
    %cst_7 = arith.constant dense<0.000000e+00> : vector<8x32xf32>
    %5 = tpu.matmul %3, %4, %cst_7 {dimension_numbers = #tpu.dot_dimension_numbers<[1], [0], [0], [1], [0, 0, 1, 1], [], []>} : vector<8x4xf32>, vector<4x32xf32>, vector<8x32xf32> -> vector<8x32xf32>
    %6 = arith.addf %2, %5 : vector<8x32xf32>
    %c0_8 = arith.constant 0 : index
    %c0_9 = arith.constant 0 : index
    %7 = vector.load %arg5[%c0_8, %c0_9] : memref<1x32xf32, #tpu.memory_space<vmem>>, vector<1x32xf32>
    %8 = vector.broadcast %7 : vector<1x32xf32> to vector<8x32xf32>
    %9 = arith.addf %6, %8 : vector<8x32xf32>
    %cst_10 = arith.constant 0.000000e+00 : f32
    %10 = vector.broadcast %cst_10 : f32 to vector<8x32xf32>
    %11 = arith.maximumf %9, %10 : vector<8x32xf32>
    %c0_11 = arith.constant 0 : index
    %c0_12 = arith.constant 0 : index
    %12 = vector.load %arg6[%c0_11, %c0_12] : memref<32x32xf32, #tpu.memory_space<vmem>>, vector<32x32xf32>
    %cst_13 = arith.constant dense<0.000000e+00> : vector<8x32xf32>
    %13 = tpu.matmul %11, %12, %cst_13 {dimension_numbers = #tpu.dot_dimension_numbers<[1], [0], [0], [1], [0, 0, 1, 1], [], []>} : vector<8x32xf32>, vector<32x32xf32>, vector<8x32xf32> -> vector<8x32xf32>
    %c0_14 = arith.constant 0 : index
    %c0_15 = arith.constant 0 : index
    %14 = vector.load %arg7[%c0_14, %c0_15] : memref<1x32xf32, #tpu.memory_space<vmem>>, vector<1x32xf32>
    %15 = vector.broadcast %14 : vector<1x32xf32> to vector<8x32xf32>
    %16 = arith.addf %13, %15 : vector<8x32xf32>
    %cst_16 = arith.constant 0.000000e+00 : f32
    %17 = vector.broadcast %cst_16 : f32 to vector<8x32xf32>
    %18 = arith.maximumf %16, %17 : vector<8x32xf32>
    %c0_17 = arith.constant 0 : index
    %c0_18 = arith.constant 0 : index
    %19 = vector.load %arg8[%c0_17, %c0_18] : memref<1x32xf32, #tpu.memory_space<vmem>>, vector<1x32xf32>
    %cst_19 = arith.constant dense<0.000000e+00> : vector<1x8xf32>
    %20 = tpu.matmul %19, %18, %cst_19 {dimension_numbers = #tpu.dot_dimension_numbers<[1], [1], [0], [0], [0, 0, 1, 0], [], []>} : vector<1x32xf32>, vector<8x32xf32>, vector<1x8xf32> -> vector<1x8xf32>
    %c0_20 = arith.constant 0 : index
    %21 = memref.load %arg9[%c0_20] : memref<1xf32, #tpu.memory_space<smem>>
    %22 = vector.broadcast %21 : f32 to vector<1x8xf32>
    %23 = arith.addf %20, %22 : vector<1x8xf32>
    %24 = vector.shape_cast %23 : vector<1x8xf32> to vector<1x1x8xf32>
    %c0_21 = arith.constant 0 : index
    %c0_22 = arith.constant 0 : index
    %c0_23 = arith.constant 0 : index
    %25 = vector.load %arg10[%c0_21, %c0_22, %c0_23] : memref<1x1x8xf32, #tpu.memory_space<vmem>>, vector<1x1x8xf32>
    tpu.vector_store %arg10[%c0_21, %c0_22, %c0_23], %24 {strides = array<i32>} : memref<1x1x8xf32, #tpu.memory_space<vmem>>, vector<1x1x8xf32>,
    return
  }
  func.func @transform_0(%arg0: i32) -> (i32, i32) {
    %c0_i32 = arith.constant 0 : i32
    %c0_i32_0 = arith.constant 0 : i32
    return %arg0, %c0_i32 : i32, i32
  }
  func.func @transform_1(%arg0: i32) -> (i32, i32) {
    %c0_i32 = arith.constant 0 : i32
    %c0_i32_0 = arith.constant 0 : i32
    return %arg0, %c0_i32 : i32, i32
  }
  func.func @transform_2(%arg0: i32) -> (i32, i32) {
    %c0_i32 = arith.constant 0 : i32
    %c0_i32_0 = arith.constant 0 : i32
    %c0_i32_1 = arith.constant 0 : i32
    return %c0_i32, %c0_i32_0 : i32, i32
  }
  func.func @transform_3(%arg0: i32) -> (i32, i32) {
    %c0_i32 = arith.constant 0 : i32
    %c0_i32_0 = arith.constant 0 : i32
    %c0_i32_1 = arith.constant 0 : i32
    return %c0_i32, %c0_i32_0 : i32, i32
  }
  func.func @transform_4(%arg0: i32) -> (i32, i32) {
    %c0_i32 = arith.constant 0 : i32
    %c0_i32_0 = arith.constant 0 : i32
    %c0_i32_1 = arith.constant 0 : i32
    return %c0_i32, %c0_i32_0 : i32, i32
  }
  func.func @transform_5(%arg0: i32) -> (i32, i32) {
    %c0_i32 = arith.constant 0 : i32
    %c0_i32_0 = arith.constant 0 : i32
    %c0_i32_1 = arith.constant 0 : i32
    return %c0_i32, %c0_i32_0 : i32, i32
  }
  func.func @transform_6(%arg0: i32) -> (i32, i32) {
    %c0_i32 = arith.constant 0 : i32
    %c0_i32_0 = arith.constant 0 : i32
    %c0_i32_1 = arith.constant 0 : i32
    return %c0_i32, %c0_i32_0 : i32, i32
  }
  func.func @transform_7(%arg0: i32) -> (i32, i32) {
    %c0_i32 = arith.constant 0 : i32
    %c0_i32_0 = arith.constant 0 : i32
    %c0_i32_1 = arith.constant 0 : i32
    return %c0_i32, %c0_i32_0 : i32, i32
  }
  func.func @transform_8(%arg0: i32) -> i32 {
    %c0_i32 = arith.constant 0 : i32
    %c0_i32_0 = arith.constant 0 : i32
    return %c0_i32 : i32
  }
  func.func @transform_9(%arg0: i32) -> (i32, i32, i32) {
    %c0_i32 = arith.constant 0 : i32
    %c0_i32_0 = arith.constant 0 : i32
    %c0_i32_1 = arith.constant 0 : i32
    return %arg0, %c0_i32, %c0_i32_0 : i32, i32, i32
  }
}

</mosaic_0001>

<bundles_post_ra>
// kernel: critic_forward.1
= control target key start
LH: loop header
LB: loop body
LE: loop exit
PB: predicated region body
PF: predicated region fallthrough
CT: control target
= control target key end

     0   :  { %vm41_vm0 = vcmask 1043456   ;;  %v423_v0 = vmov 0.0   ;;  %vm37_vm1 = vcmask 31744   ;;  %vm115_vm2 = vcmask 64512   ;;  %s515_s3 = inlined_call_operand.vmem [shape: f32[4,32], index: 3, kind: input, shape index: {}]   ;;  %s516_s2 = inlined_call_operand.vmem [shape: f32[8,32], index: 2, kind: input, shape index: {}]   ;;  %s517_s1 = inlined_call_operand.vmem [shape: f32[8,4], index: 1, kind: input, shape index: {}]   ;;  %s518_s0 = inlined_call_operand.vmem [shape: f32[8,8], index: 0, kind: input, shape index: {}]   ;;  %s519_s5 = inlined_call_operand.vmem [shape: f32[32,32], index: 5, kind: input, shape index: {}]   ;;  %s520_s4 = inlined_call_operand.vmem [shape: f32[1,32], index: 4, kind: input, shape index: {}]   ;;  %s521_s6 = inlined_call_operand.vmem [shape: f32[1,32], index: 6, kind: input, shape index: {}]   ;;  %s522_s7 = inlined_call_operand.vmem [shape: f32[1,32], index: 7, kind: input, shape index: {}]   ;;  %s523_s8 = inlined_call_operand.<no memory space> [shape: f32[1], index: 8, kind: input, shape index: {}]   ;;  %s524_s9 = inlined_call_operand.vmem [shape: f32[1,1,8], index: 9, kind: output, shape index: {}]  }
   0x1   :  { %388 = vmatprep.subr.mxu0 %v423_v0  ;;  %393 = vmatprep.subr.mxu1 %v423_v0  ;;  %v36_v1 = vld [vmem:[%s515_s3] sm:$0xf]  ;;  %vm424_vm3 = vmmov 0   ;;  %v425_v5 = vmov 0.0|0.0   ;;  %v199_v7 = vld [vmem:[%s519_s5 + $0x8] sm:$0xff]  ;;  %v200_v9 = vld [vmem:[%s519_s5 + $0x10] sm:$0xff]  ;;  %v286_v26 = vstv %s523_s8 }
   0x2   :  { %v34_v2 = vld [vmem:[%s516_s2] sm:$0xff]  ;;  %389 = vmatpush3.msk.msra.mxu0 %vm41_vm0, %v36_v1  ;;  %390 = vmatprep.mubr.msk.f32.mxu0 %vm424_vm3, %v423_v0  ;;  %v201_v10 = vld [vmem:[%s519_s5 + $0x18] sm:$0xff]  ;;  %vm209_vm4 = vcmask 261120   ;;  %vm363_vm5 = vcmask 57344  }
   0x3   :  { %v35_v3 = vld [vmem:[%s517_s1] sm:$0xff]  ;;  %394 = vmatpush3.msra.mxu1 %v34_v2  ;;  %395 = vmatprep.mubr.msk.f32.mxu1 %vm424_vm3, %v423_v0  ;;  %v418_v11 = vpack.c.bf16 %v201_v10, %v200_v9 }
   0x4   :  { %v33_v4 = vld [vmem:[%s518_s0] sm:$0xff]  ;;  %391 = vmatmul.mubr.msk.f32.vlgmr.msra.gmra.mrb[0].mxu0 %vm37_vm1, %v35_v3  ;;  %414 = vmatprep.subr.bf16.mxu0 %v425_v5 }
   0x5   :  { %396 = vmatmul.mubr.msk.f32.vlgmr.msra.gmra.mrb[0].mxu1 %vm115_vm2, %v33_v4  ;;  %406 = vmatprep.mubr.msk.f32.mxu0 %vm424_vm3, %v423_v0  ;;  %v198_v6 = vld [vmem:[%s519_s5] sm:$0xff] }
   0x6   :  { %409 = vmatprep.subr.mxu1 %v423_v0  ;;  %411 = vmatprep.mubr.msk.f32.mxu1 %vm424_vm3, %v423_v0  ;;  %v415_v8 = vpack.c.bf16 %v199_v7, %v198_v6  ;;  %v372_v14 = vld [vmem:[%s520_s4] ss:$0 sm:$0xff] }
   0x7   :  { %v373_v20 = vld [vmem:[%s521_s6] ss:$0 sm:$0xff] }
   0x8   :  { %416 = vmatpush3.bf16.msra.mxu0 %v415_v8  ;;  %v284_v25 = vld [vmem:[%s522_s7] sm:$0x1] }
   0x9   :  { %417 = vmatprep.subr.bf16.mxu0 %v425_v5 }
   0xc   :  { %419 = vmatpush3.bf16.msra.mxu0 %v418_v11 }
  0xd7   :  { %v111_v12 = vpop.f32.mrb[0].mxu0 }
  0xd8   :  { %v185_v13 = vpop.f32.mrb[0].mxu1  ;;  %v392_v16 = vpop.f32.mrb[1].mxu0 }
  0xd9   :  { %v186_v15 = vadd.f32 %v185_v13, %v111_v12  ;;  %v397_v17 = vpop.f32.mrb[1].mxu1 }
  0xdb   :  { %v196_v18 = vadd.f32 %v372_v14, %v186_v15 }
  0xdd   :  { %v197_v19 = vmax.f32 %v196_v18, 0.0 }
  0xdf   :  { %407 = vmatmul.mubr.msk.f32.vlgmr.msra.gmra.mrb[2].mxu0 %vm209_vm4, %v197_v19 }
 0x1b2   :  { %v279_v21 = vpop.f32.mrb[2].mxu0 }
 0x1b3   :  { %v280_v22 = vadd.f32 %v373_v20, %v279_v21  ;;  %v408_v23 = vpop.f32.mrb[3].mxu0 }
 0x1b5   :  { %v283_v24 = vmax.f32 %v280_v22, 0.0 }
 0x1b7   :  { %410 = vmatpush3.xpose.msk.msra.mxu1 %vm209_vm4, %v283_v24 }
 0x1ba   :  { %412 = vmatmul.mubr.msk.f32.vlgmr.msra.gmra.mrb[2].mxu1 %vm209_vm4, %v284_v25 }
 0x28d   :  { %v359_v27 = vpop.f32.mrb[2].mxu1 }
 0x28e   :  { %v360_v28 = vadd.f32 %v359_v27, %v286_v26  ;;  %v413_v29 = vpop.f32.mrb[3].mxu1 }
 0x290   :  { %364 = vst.msk [vmem:[%s524_s9] sm:$0x1] %vm363_vm5, %v360_v28 }

</bundles_post_ra>
